<compile_context>
chip_gen: v5e
topology: v5e:2x2
jax: 0.10.0
libtpu: 0.0.40
codegen_flags: <defaults>
</compile_context>

<pallas_src>
import jax
import jax.numpy as jnp
from jax.experimental import pallas as pl
from jax.experimental.pallas import tpu as pltpu

HIDDEN_DIM = 32        # hidden_dim
FILLER_SET_SIZE = 64   # filler_set_size
OUT_PAD = 128          # lane-dense padded vocab width inside the kernel
OUT_SLAB_ROWS = HIDDEN_DIM + 8   # w_out rows (32) + bias row padded to a full 8-row tile
NEG_BIG = -1e30        # effectively -inf for the padded logit lanes (avoids inf-inf NaN)


def decoder_step_kernel(tok_ref,                      # scalar prefetch (SMEM), unused in body
                        emb_ref, h_ref, wg_ref, bg_ref, oslab_ref,
                        logp_ref, hnew_ref):
    H = HIDDEN_DIM

    # embedding(input).view(1,1,-1); F.relu   -> (1, H)
    x = jnp.maximum(emb_ref[0], 0.0)          # emb_ref block is (1, 1, H)
    h = h_ref[...]                            # (1, H)

    # Single fused gate matmul: (1, 2H) @ (2H, 4H) -> (1, 4H)
    xh = jnp.concatenate([x, h], axis=1)      # (1, 2H)
    gates = jnp.dot(xh, wg_ref[...], preferred_element_type=jnp.float32) + bg_ref[...]

    # PyTorch nn.GRU cell:
    #   r = sigma(W_ir x + b_ir + W_hr h + b_hr)
    #   z = sigma(W_iz x + b_iz + W_hz h + b_hz)
    #   n = tanh (W_in x + b_in + r * (W_hn h + b_hn))
    #   h' = (1 - z) * n + z * h
    r = jax.nn.sigmoid(gates[:, 0:H])
    z = jax.nn.sigmoid(gates[:, H:2 * H])
    n = jnp.tanh(gates[:, 2 * H:3 * H] + r * gates[:, 3 * H:4 * H])
    h_new = (1.0 - z) * n + z * h             # (1, H)
    hnew_ref[...] = h_new

    # out_layer + LogSoftmax on a lane-dense 128-wide slab
    # (pad columns carry -1e30 bias -> exp underflows to 0, normalizer exact).
    slab = oslab_ref[...]                     # (OUT_SLAB_ROWS, 128)
    w_out = slab[0:H, :]                      # (H, 128)
    b_out = slab[H:H + 1, :]                  # (1, 128)
    logits = jnp.dot(h_new, w_out, preferred_element_type=jnp.float32) + b_out
    m = jnp.max(logits, axis=1, keepdims=True)
    shifted = logits - m
    lse = jnp.log(jnp.sum(jnp.exp(shifted), axis=1, keepdims=True))
    logp_ref[...] = (shifted - lse)[:, :FILLER_SET_SIZE]


def init_params(key, hidden_dim=HIDDEN_DIM, vocab=FILLER_SET_SIZE):
    ks = jax.random.split(key, 16)
    bound = 1.0 / jnp.sqrt(hidden_dim)

    def u(k, shape):
        return jax.random.uniform(k, shape, jnp.float32, -bound, bound)

    return {
        "embedding": jax.random.normal(ks[0], (vocab, hidden_dim), jnp.float32),
        # GRU weights stored transposed: [in_features, out_features]
        "w_ir": u(ks[1], (hidden_dim, hidden_dim)),
        "w_iz": u(ks[2], (hidden_dim, hidden_dim)),
        "w_in": u(ks[3], (hidden_dim, hidden_dim)),
        "w_hr": u(ks[4], (hidden_dim, hidden_dim)),
        "w_hz": u(ks[5], (hidden_dim, hidden_dim)),
        "w_hn": u(ks[6], (hidden_dim, hidden_dim)),
        "b_ir": u(ks[7], (1, hidden_dim)),
        "b_iz": u(ks[8], (1, hidden_dim)),
        "b_in": u(ks[9], (1, hidden_dim)),
        "b_hr": u(ks[10], (1, hidden_dim)),
        "b_hz": u(ks[11], (1, hidden_dim)),
        "b_hn": u(ks[12], (1, hidden_dim)),
        # Linear out_layer, transposed: [hidden, vocab]
        "w_out": u(ks[13], (hidden_dim, vocab)),
        "b_out": u(ks[14], (1, vocab)),
    }


def pack_params(params):
    """Host-side one-time repacking of the 15 parameter tensors into 4 slabs."""
    H, V = HIDDEN_DIM, FILLER_SET_SIZE
    z = jnp.zeros((H, H), jnp.float32)

    # (2H, 4H) fused gate weight slab
    w_gates = jnp.concatenate([
        jnp.concatenate([params["w_ir"], params["w_iz"], params["w_in"], z], axis=1),
        jnp.concatenate([params["w_hr"], params["w_hz"], z, params["w_hn"]], axis=1),
    ], axis=0)

    # (1, 4H) fused gate bias
    b_gates = jnp.concatenate([
        params["b_ir"] + params["b_hr"],
        params["b_iz"] + params["b_hz"],
        params["b_in"],
        params["b_hn"],
    ], axis=1)

    # (OUT_SLAB_ROWS, 128) output slab: rows 0..H-1 = w_out (zero-padded cols),
    # row H = b_out (pad cols = -1e30), remaining rows are sublane padding.
    w_out_pad = jnp.zeros((H, OUT_PAD), jnp.float32).at[:, :V].set(params["w_out"])
    b_out_pad = jnp.full((1, OUT_PAD), NEG_BIG, jnp.float32).at[:, :V].set(params["b_out"])
    tail = jnp.zeros((OUT_SLAB_ROWS - H - 1, OUT_PAD), jnp.float32)
    out_slab = jnp.concatenate([w_out_pad, b_out_pad, tail], axis=0)

    return {
        # (V, 1, H) layout so the gathered block's last two dims equal the full dims
        "embedding3": params["embedding"].reshape(V, 1, HIDDEN_DIM),
        "w_gates": w_gates,
        "b_gates": b_gates,
        "out_slab": out_slab,
    }


def decoder_forward(packed, token_idx, hidden):
    """token_idx: int32 (1,); hidden: (1, 1, H) f32.

    Returns (log_probs (1, V), new_hidden (1, 1, H)) — same as the PyTorch module.
    """
    h = hidden.reshape(1, HIDDEN_DIM)
    tok = token_idx.astype(jnp.int32)

    grid_spec = pltpu.PrefetchScalarGridSpec(
        num_scalar_prefetch=1,
        grid=(1,),
        in_specs=[
            # embedding row gather: data-dependent block index from the prefetched token
            pl.BlockSpec((1, 1, HIDDEN_DIM), lambda i, t: (t[0], 0, 0)),
            pl.BlockSpec((1, HIDDEN_DIM), lambda i, t: (0, 0)),
            pl.BlockSpec((2 * HIDDEN_DIM, 4 * HIDDEN_DIM), lambda i, t: (0, 0)),
            pl.BlockSpec((1, 4 * HIDDEN_DIM), lambda i, t: (0, 0)),
            pl.BlockSpec((OUT_SLAB_ROWS, OUT_PAD), lambda i, t: (0, 0)),
        ],
        out_specs=[
            pl.BlockSpec((1, FILLER_SET_SIZE), lambda i, t: (0, 0)),
            pl.BlockSpec((1, HIDDEN_DIM), lambda i, t: (0, 0)),
        ],
    )

    logp, h_new = pl.pallas_call(
        decoder_step_kernel,
        grid_spec=grid_spec,
        out_shape=(
            jax.ShapeDtypeStruct((1, FILLER_SET_SIZE), jnp.float32),
            jax.ShapeDtypeStruct((1, HIDDEN_DIM), jnp.float32),
        ),
        compiler_params=pltpu.CompilerParams(dimension_semantics=("arbitrary",)),
    )(tok, packed["embedding3"], h, packed["w_gates"], packed["b_gates"], packed["out_slab"])

    return logp, h_new.reshape(1, 1, HIDDEN_DIM)


def decoder_forward_ref(params, token_idx, hidden):
    """Pure-JAX reference (unpacked params) for sanity checking."""
    x = jnp.maximum(params["embedding"][token_idx[0]].reshape(1, HIDDEN_DIM), 0.0)
    h = hidden.reshape(1, HIDDEN_DIM)
    r = jax.nn.sigmoid(x @ params["w_ir"] + params["b_ir"] + h @ params["w_hr"] + params["b_hr"])
    z = jax.nn.sigmoid(x @ params["w_iz"] + params["b_iz"] + h @ params["w_hz"] + params["b_hz"])
    n = jnp.tanh(x @ params["w_in"] + params["b_in"] + r * (h @ params["w_hn"] + params["b_hn"]))
    h_new = (1.0 - z) * n + z * h
    logits = h_new @ params["w_out"] + params["b_out"]
    logp = jax.nn.log_softmax(logits, axis=1)
    return logp, h_new.reshape(1, 1, HIDDEN_DIM)


if __name__ == "__main__":
    key = jax.random.PRNGKey(0)
    pkey, hkey = jax.random.split(key)
    params = init_params(pkey)
    packed = pack_params(params)

    token_idx = jnp.array([3], dtype=jnp.int32)                        # decoder input token
    hidden = jax.random.normal(hkey, (1, 1, HIDDEN_DIM), jnp.float32)  # GRU hidden state

    logp, h_new = decoder_forward(packed, token_idx, hidden)
    jax.block_until_ready((logp, h_new))

    logp_ref, h_ref = decoder_forward_ref(params, token_idx, hidden)
    assert logp.shape == (1, FILLER_SET_SIZE)
    assert h_new.shape == (1, 1, HIDDEN_DIM)
    assert jnp.allclose(logp, logp_ref, atol=1e-5, rtol=1e-5)
    assert jnp.allclose(h_new, h_ref, atol=1e-5, rtol=1e-5)

    print("KERNEL_OK")
</pallas_src>

<mosaic_0001>
module attributes {stable_mosaic.version = 11 : i64} {
  func.func @decoder_step_kernel(%arg0: i32, %arg1: memref<1xi32, #tpu.memory_space<smem>>, %arg2: memref<1x1x32xf32, #tpu.memory_space<vmem>>, %arg3: memref<1x32xf32, #tpu.memory_space<vmem>>, %arg4: memref<64x128xf32, #tpu.memory_space<vmem>>, %arg5: memref<1x128xf32, #tpu.memory_space<vmem>>, %arg6: memref<40x128xf32, #tpu.memory_space<vmem>>, %arg7: memref<1x64xf32, #tpu.memory_space<vmem>>, %arg8: memref<1x32xf32, #tpu.memory_space<vmem>>) attributes {dimension_semantics = [#tpu.dimension_semantics<arbitrary>], iteration_bounds = array<i64: 1>, scalar_prefetch = 1 : i64, scratch_operands = 0 : i64, tpu.core_type = #tpu.core_type<tc>, window_params = [{transform_indices = @transform_0, window_bounds = array<i64: 1, 1, 32>}, {pipeline_mode = #tpu.pipeline_mode<synchronous>, transform_indices = @transform_1, window_bounds = array<i64: 1, 32>}, {pipeline_mode = #tpu.pipeline_mode<synchronous>, transform_indices = @transform_2, window_bounds = array<i64: 64, 128>}, {pipeline_mode = #tpu.pipeline_mode<synchronous>, transform_indices = @transform_3, window_bounds = array<i64: 1, 128>}, {pipeline_mode = #tpu.pipeline_mode<synchronous>, transform_indices = @transform_4, window_bounds = array<i64: 40, 128>}, {pipeline_mode = #tpu.pipeline_mode<synchronous>, transform_indices = @transform_5, window_bounds = array<i64: 1, 64>}, {pipeline_mode = #tpu.pipeline_mode<synchronous>, transform_indices = @transform_6, window_bounds = array<i64: 1, 32>}]} {
    %c0 = arith.constant 0 : index
    %c0_0 = arith.constant 0 : index
    %c0_1 = arith.constant 0 : index
    %0 = vector.load %arg2[%c0, %c0_0, %c0_1] : memref<1x1x32xf32, #tpu.memory_space<vmem>>, vector<1x1x32xf32>
    %1 = vector.shape_cast %0 : vector<1x1x32xf32> to vector<1x32xf32>
    %cst = arith.constant 0.000000e+00 : f32
    %2 = vector.broadcast %cst : f32 to vector<1x32xf32>
    %3 = arith.maximumf %1, %2 : vector<1x32xf32>
    %c0_2 = arith.constant 0 : index
    %c0_3 = arith.constant 0 : index
    %4 = vector.load %arg3[%c0_2, %c0_3] : memref<1x32xf32, #tpu.memory_space<vmem>>, vector<1x32xf32>
    %5 = tpu.concatenate %3, %4 in 1 : vector<1x32xf32>, vector<1x32xf32> -> vector<1x64xf32>
    %c0_4 = arith.constant 0 : index
    %c0_5 = arith.constant 0 : index
    %6 = vector.load %arg4[%c0_4, %c0_5] : memref<64x128xf32, #tpu.memory_space<vmem>>, vector<64x128xf32>
    %cst_6 = arith.constant dense<0.000000e+00> : vector<1x128xf32>
    %7 = tpu.matmul %5, %6, %cst_6 {dimension_numbers = #tpu.dot_dimension_numbers<[1], [0], [0], [1], [0, 0, 1, 1], [], []>} : vector<1x64xf32>, vector<64x128xf32>, vector<1x128xf32> -> vector<1x128xf32>
    %c0_7 = arith.constant 0 : index
    %c0_8 = arith.constant 0 : index
    %8 = vector.load %arg5[%c0_7, %c0_8] : memref<1x128xf32, #tpu.memory_space<vmem>>, vector<1x128xf32>
    %9 = arith.addf %7, %8 : vector<1x128xf32>
    %10 = vector.extract_strided_slice %9 {offsets = [0, 0], sizes = [1, 32], strides = [1, 1]} : vector<1x128xf32> to vector<1x32xf32>
    %11 = arith.negf %10 : vector<1x32xf32>
    %12 = math.exp %11 : vector<1x32xf32>
    %cst_9 = arith.constant 1.000000e+00 : f32
    %13 = vector.broadcast %cst_9 : f32 to vector<1x32xf32>
    %14 = arith.addf %13, %12 : vector<1x32xf32>
    %15 = arith.divf %13, %14 : vector<1x32xf32>
    %16 = vector.extract_strided_slice %9 {offsets = [0, 32], sizes = [1, 32], strides = [1, 1]} : vector<1x128xf32> to vector<1x32xf32>
    %17 = arith.negf %16 : vector<1x32xf32>
    %18 = math.exp %17 : vector<1x32xf32>
    %cst_10 = arith.constant 1.000000e+00 : f32
    %19 = vector.broadcast %cst_10 : f32 to vector<1x32xf32>
    %20 = arith.addf %19, %18 : vector<1x32xf32>
    %21 = arith.divf %19, %20 : vector<1x32xf32>
    %22 = vector.extract_strided_slice %9 {offsets = [0, 64], sizes = [1, 32], strides = [1, 1]} : vector<1x128xf32> to vector<1x32xf32>
    %23 = vector.extract_strided_slice %9 {offsets = [0, 96], sizes = [1, 32], strides = [1, 1]} : vector<1x128xf32> to vector<1x32xf32>
    %24 = arith.mulf %15, %23 : vector<1x32xf32>
    %25 = arith.addf %22, %24 : vector<1x32xf32>
    %26 = math.tanh %25 : vector<1x32xf32>
    %cst_11 = arith.constant 1.000000e+00 : f32
    %27 = vector.broadcast %cst_11 : f32 to vector<1x32xf32>
    %28 = arith.subf %27, %21 : vector<1x32xf32>
    %29 = arith.mulf %28, %26 : vector<1x32xf32>
    %30 = arith.mulf %21, %4 : vector<1x32xf32>
    %31 = arith.addf %29, %30 : vector<1x32xf32>
    %c0_12 = arith.constant 0 : index
    %c0_13 = arith.constant 0 : index
    %32 = vector.load %arg8[%c0_12, %c0_13] : memref<1x32xf32, #tpu.memory_space<vmem>>, vector<1x32xf32>
    tpu.vector_store %arg8[%c0_12, %c0_13], %31 {strides = array<i32>} : memref<1x32xf32, #tpu.memory_space<vmem>>, vector<1x32xf32>,
    %c0_14 = arith.constant 0 : index
    %c0_15 = arith.constant 0 : index
    %33 = vector.load %arg6[%c0_14, %c0_15] : memref<40x128xf32, #tpu.memory_space<vmem>>, vector<40x128xf32>
    %34 = vector.extract_strided_slice %33 {offsets = [0, 0], sizes = [32, 128], strides = [1, 1]} : vector<40x128xf32> to vector<32x128xf32>
    %35 = vector.extract_strided_slice %33 {offsets = [32, 0], sizes = [1, 128], strides = [1, 1]} : vector<40x128xf32> to vector<1x128xf32>
    %cst_16 = arith.constant dense<0.000000e+00> : vector<1x128xf32>
    %36 = tpu.matmul %31, %34, %cst_16 {dimension_numbers = #tpu.dot_dimension_numbers<[1], [0], [0], [1], [0, 0, 1, 1], [], []>} : vector<1x32xf32>, vector<32x128xf32>, vector<1x128xf32> -> vector<1x128xf32>
    %37 = arith.addf %36, %35 : vector<1x128xf32>
    %cst_17 = arith.constant dense<0xFF800000> : vector<1xf32>
    %38 = vector.multi_reduction <maximumf>, %37, %cst_17 [1] : vector<1x128xf32> to vector<1xf32>
    %39 = vector.shape_cast %38 : vector<1xf32> to vector<1x1xf32>
    %40 = vector.broadcast %39 : vector<1x1xf32> to vector<1x128xf32>
    %41 = arith.subf %37, %40 : vector<1x128xf32>
    %42 = math.exp %41 : vector<1x128xf32>
    %cst_18 = arith.constant dense<0.000000e+00> : vector<1xf32>
    %43 = vector.multi_reduction <add>, %42, %cst_18 [1] : vector<1x128xf32> to vector<1xf32>
    %44 = vector.shape_cast %43 : vector<1xf32> to vector<1x1xf32>
    %45 = math.log %44 : vector<1x1xf32>
    %46 = vector.broadcast %45 : vector<1x1xf32> to vector<1x128xf32>
    %47 = arith.subf %41, %46 : vector<1x128xf32>
    %48 = vector.extract_strided_slice %47 {offsets = [0, 0], sizes = [1, 64], strides = [1, 1]} : vector<1x128xf32> to vector<1x64xf32>
    %c0_19 = arith.constant 0 : index
    %c0_20 = arith.constant 0 : index
    %49 = vector.load %arg7[%c0_19, %c0_20] : memref<1x64xf32, #tpu.memory_space<vmem>>, vector<1x64xf32>
    tpu.vector_store %arg7[%c0_19, %c0_20], %48 {strides = array<i32>} : memref<1x64xf32, #tpu.memory_space<vmem>>, vector<1x64xf32>,
    return
  }
  func.func @transform_0(%arg0: i32, %arg1: memref<1xi32, #tpu.memory_space<smem>>) -> (i32, i32, i32) {
    %c0 = arith.constant 0 : index
    %0 = memref.load %arg1[%c0] : memref<1xi32, #tpu.memory_space<smem>>
    %c0_i32 = arith.constant 0 : i32
    %c0_i32_0 = arith.constant 0 : i32
    %c0_i32_1 = arith.constant 0 : i32
    return %0, %c0_i32, %c0_i32_0 : i32, i32, i32
  }
  func.func @transform_1(%arg0: i32, %arg1: memref<1xi32, #tpu.memory_space<smem>>) -> (i32, i32) {
    %c0_i32 = arith.constant 0 : i32
    %c0_i32_0 = arith.constant 0 : i32
    %c0_i32_1 = arith.constant 0 : i32
    return %c0_i32, %c0_i32_0 : i32, i32
  }
  func.func @transform_2(%arg0: i32, %arg1: memref<1xi32, #tpu.memory_space<smem>>) -> (i32, i32) {
    %c0_i32 = arith.constant 0 : i32
    %c0_i32_0 = arith.constant 0 : i32
    %c0_i32_1 = arith.constant 0 : i32
    return %c0_i32, %c0_i32_0 : i32, i32
  }
  func.func @transform_3(%arg0: i32, %arg1: memref<1xi32, #tpu.memory_space<smem>>) -> (i32, i32) {
    %c0_i32 = arith.constant 0 : i32
    %c0_i32_0 = arith.constant 0 : i32
    %c0_i32_1 = arith.constant 0 : i32
    return %c0_i32, %c0_i32_0 : i32, i32
  }
  func.func @transform_4(%arg0: i32, %arg1: memref<1xi32, #tpu.memory_space<smem>>) -> (i32, i32) {
    %c0_i32 = arith.constant 0 : i32
    %c0_i32_0 = arith.constant 0 : i32
    %c0_i32_1 = arith.constant 0 : i32
    return %c0_i32, %c0_i32_0 : i32, i32
  }
  func.func @transform_5(%arg0: i32, %arg1: memref<1xi32, #tpu.memory_space<smem>>) -> (i32, i32) {
    %c0_i32 = arith.constant 0 : i32
    %c0_i32_0 = arith.constant 0 : i32
    %c0_i32_1 = arith.constant 0 : i32
    return %c0_i32, %c0_i32_0 : i32, i32
  }
  func.func @transform_6(%arg0: i32, %arg1: memref<1xi32, #tpu.memory_space<smem>>) -> (i32, i32) {
    %c0_i32 = arith.constant 0 : i32
    %c0_i32_0 = arith.constant 0 : i32
    %c0_i32_1 = arith.constant 0 : i32
    return %c0_i32, %c0_i32_0 : i32, i32
  }
}

</mosaic_0001>

<bundles_post_ra>
// kernel: tpu_custom_call.1
= control target key start
LH: loop header
LB: loop body
LE: loop exit
PB: predicated region body
PF: predicated region fallthrough
CT: control target
= control target key end

     0   :  { %14 = vsyncpa [#allocation5], 0  ;;  %s419_s0 = inlined_call_operand.<no memory space> [shape: s32[1], index: 0, kind: input, shape index: {}]   ;;  %s420_s1 = inlined_call_operand.vmem [shape: f32[64,1,32], index: 1, kind: input, shape index: {}]   ;;  %s421_s2 = inlined_call_operand.vmem [shape: f32[1,32], index: 2, kind: input, shape index: {}]   ;;  %s422_s3 = inlined_call_operand.vmem [shape: f32[64,128], index: 3, kind: input, shape index: {}]   ;;  %s423_s4 = inlined_call_operand.vmem [shape: f32[1,128], index: 4, kind: input, shape index: {}]   ;;  %s424_s5 = inlined_call_operand.hbm [shape: f32[40,128], index: 5, kind: input, shape index: {}]   ;;  %s425_s6 = inlined_call_operand.hbm [shape: f32[1,64], index: 6, kind: output, shape index: {0}]   ;;  %s426_s7 = inlined_call_operand.hbm [shape: f32[1,32], index: 7, kind: output, shape index: {1}]  }
   0x1   :  { %15 = vsyncpa [#allocation6], 0 }
   0x2   :  { %16 = vsyncpa [#allocation9], 0  ;;  %s34_s26 = sshll.u32 %s424_s5, 4  ;;  %s321_s27 = smov [#allocation4]   ;;  %s35_s26 = int_to_ptr.hbm [resolvable:$true] %s34_s26 }
   0x3   :  { %s36_s28 = sshll.u32 %s321_s27, 4  ;;  %s322_s29 = smov 128   ;;  %s37_s28 = int_to_ptr.vmem [resolvable:$true] %s36_s28 }
   0x4   :  { %s323_s30 = smov 8  }
   0x5   :  { %42 = dma.hbm_to_vmem [thread:$0]  %s35_s26, 640, %s37_s28, [#allocation5], %s322_s29, %s322_s29, %s323_s30  }
   0x6   :  { %315 = dma.done.wait [#allocation5], 640  }
   0x7   :  { %316 = vsyncadd [#allocation5], 4294966656  ;;  %v232_v0 = vld [vmem:[%s421_s2] ss:$0 sm:$0xff]  ;;  %v73_v1 = vld [vmem:[%s422_s3 + $0x38] sm:$0xff]  ;;  %s324_s13 = smov 32  }
   0x8   :  { %87 = vmatpush.msra.mxu0 %v73_v1  ;;  %v72_v2 = vld [vmem:[%s422_s3 + $0x30] sm:$0xff]  ;;  %61 = vrot.lane.b32.xlu0 %v232_v0, %s324_s13  ;;  %v71_v3 = vld [vmem:[%s422_s3 + $0x28] sm:$0xff]  ;;  %v70_v4 = vld [vmem:[%s422_s3 + $0x20] sm:$0xff]  ;;  %p52_p0 = scmp.lt.s32.totalorder %s419_s0, 63  ;;  %vm64_vm0 = vcmask 261120   ;;  %vm75_vm1 = vcmask 523264  }
   0x9   :  { %v69_v5 = vld [vmem:[%s422_s3 + $0x18] sm:$0xff]  ;;  %v68_v6 = vld [vmem:[%s422_s3 + $0x10] sm:$0xff]  ;;  %v67_v7 = vld [vmem:[%s422_s3 + $0x8] sm:$0xff]  ;;  %vm141_vm6 = vcmask 253952   ;;  %vm170_vm7 = vcmask 1040384   ;;  %s203_s5 = sshll.u32 %s426_s7, 4  ;;  %s204_s5 = int_to_ptr.hbm [resolvable:$true] %s203_s5 }
   0xa   :  { %88 = vmatpush.msra.mxu0 %v72_v2  ;;  %v66_v8 = vld [vmem:[%s422_s3] sm:$0xff]  ;;  %s428_s0 = smov (!%p52_p0, %s419_s0), 63  ;;  %v146_v34 = vld [vmem:[#allocation4 + $0x18] sm:$0xff]  ;;  %v145_v35 = vld [vmem:[#allocation4 + $0x10] sm:$0xff]  ;;  %s192_s17 = sshll.u32 %s425_s6, 4  ;;  %vm183_vm8 = vcmask 516096   ;;  %s193_s17 = int_to_ptr.hbm [resolvable:$true] %s192_s17 }
   0xb   :  { %s54_s8 = scalar_lea.vmem %s420_s1, %s428_s0  ;;  %v74_v13 = vld [vmem:[%s423_s4] sm:$0x1]  ;;  %s325_s0 = smov 64   ;;  %162 = vmatpush.msra.mxu1 %v146_v34  ;;  %v144_v36 = vld [vmem:[#allocation4 + $0x8] sm:$0xff] }
   0xc   :  { %89 = vmatpush.msra.mxu0 %v71_v3  ;;  %v56_v9 = vld [vmem:[%s54_s8] sm:$0x1]  ;;  %s326_s1 = smov 96   ;;  %s327_s4 = smov [#allocation8]  }
   0xd   :  { %v57_v10 = vmax.f32 %v56_v9, 0.0  ;;  %163 = vmatpush.msra.mxu1 %v145_v35  ;;  %v143_v37 = vld [vmem:[#allocation4] sm:$0xff]  ;;  %s201_s10 = sshll.u32 %s327_s4, 4  ;;  %s202_s10 = int_to_ptr.vmem [resolvable:$true] %s201_s10 }
   0xe   :  { %90 = vmatpush.msra.mxu0 %v70_v4  ;;  %v147_v44 = vld [vmem:[#allocation4 + $0x20] sm:$0xff] }
   0xf   :  { %164 = vmatpush.msra.mxu1 %v144_v36 }
  0x10   :  { %91 = vmatpush.msra.mxu0 %v69_v5 }
  0x11   :  { %165 = vmatpush.msra.mxu1 %v143_v37 }
  0x12   :  { %92 = vmatpush.msra.mxu0 %v68_v6 }
  0x14   :  { %93 = vmatpush.msra.mxu0 %v67_v7 }
  0x16   :  { %94 = vmatpush.msra.mxu0 %v66_v8 }
  0x7a   :  { %v62_v11 = vpop.permute.xlu0 %61 }
  0x7b   :  { %v65_v12 = vsel %vm64_vm0, %v57_v10, %v62_v11 }
  0x7c   :  { %221 = vmatmul.msk.f32.vlgmr.msra.gmra.mxu0 %vm75_vm1, %v65_v12 }
  0xf9   :  { %v96_v14 = vpop.f32.mrf.mxu0 }
  0xfa   :  { %v97_v15 = vadd.f32 %v96_v14, %v74_v13 }
  0xfc   :  { %119 = vrot.lane.b32.xlu0 %v97_v15, %s324_s13  ;;  %v222_v16 = vmul.f32 -1.442695, %v97_v15  ;;  %s328_s13 = smov [#allocation7]  }
  0xfd   :  { %s190_s14 = sshll.u32 %s328_s13, 4  ;;  %s191_s14 = int_to_ptr.vmem [resolvable:$true] %s190_s14 }
  0xfe   :  { %233 = vpow2.f32 %v222_v16 }
 0x104   :  { %v234_v17 = vpop.eup %233 }
 0x105   :  { %v102_v18 = vadd.f32 1.0, %v234_v17 }
 0x107   :  { %235 = vrcp.f32 %v102_v18  ;;  %v114_v24 = vand.u32 2147483648, %v102_v18  ;;  %vm108_vm3 = vweird.f32 %v102_v18  ;;  %v112_v25 = vand.u32 2147483647, %v102_v18 }
 0x109   :  { %v115_v27 = vor.u32 1.1754944e-38, %v114_v24  ;;  %vm113_vm5 = vcmp.eq.f32.partialorder %v112_v25, 8.507059e+37 }
 0x10d   :  { %v236_v19 = vpop.eup %235 }
 0x10e   :  { %v104_v20 = vmul.f32 %v236_v19, %v102_v18  ;;  %vm109_vm2 = vweird.f32 %v236_v19 }
 0x10f   :  { %vm110_vm4 = vmor %vm108_vm3, %vm109_vm2 }
 0x110   :  { %v105_v21 = vsub.f32 1.0, %v104_v20 }
 0x112   :  { %v106_v22 = vmul.f32 %v236_v19, %v105_v21 }
 0x114   :  { %v107_v23 = vadd.f32 %v236_v19, %v106_v22 }
 0x116   :  { %v111_v26 = vsel %vm110_vm4, %v236_v19, %v107_v23 }
 0x117   :  { %v116_v29 = vsel %vm113_vm5, %v115_v27, %v111_v26 }
 0x118   :  { %v129_v38 = vsub.f32 1.0, %v116_v29  ;;  %v135_v41 = vmul.f32 %v116_v29, %v62_v11 }
 0x16e   :  { %v120_v28 = vpop.permute.xlu0 %119 }
 0x16f   :  { %v122_v30 = vmul.f32 %v120_v28, %v116_v29 }
 0x171   :  { %124 = vrot.lane.b32.xlu1 %v122_v30, %s325_s0 }
 0x1e3   :  { %v125_v31 = vpop.permute.xlu1 %124 }
 0x1e4   :  { %v127_v32 = vadd.f32 %v125_v31, %v97_v15 }
 0x1e6   :  { %237 = vtanh.f32 %v127_v32 }
 0x1ec   :  { %v238_v33 = vpop.eup %237 }
 0x1ed   :  { %131 = vrot.lane.b32.xlu1 %v238_v33, %s326_s1 }
 0x25f   :  { %v132_v39 = vpop.permute.xlu1 %131 }
 0x260   :  { %v134_v40 = vmul.f32 %v132_v39, %v129_v38 }
 0x262   :  { %v136_v42 = vadd.f32 %v135_v41, %v134_v40 }
 0x264   :  { %138 = vrot.lane.b32.xlu2 %v136_v42, %s326_s1 }
 0x2be   :  { %v139_v43 = vpop.permute.xlu2 %138 }
 0x2bf   :  { %142 = vst.msk [vmem:[#allocation8] sm:$0x1] %vm141_vm6, %v139_v43  ;;  %223 = vmatmul.msk.f32.vlgmr.msra.gmra.mxu1 %vm64_vm0, %v139_v43 }
 0x2c0   :  { %206 = dma.vmem_to_hbm [thread:$0]  %s202_s10, 16, %s204_s5, [#allocation9]  }
 0x33c   :  { %v167_v45 = vpop.f32.mrf.mxu1 }
 0x33d   :  { %v168_v46 = vadd.f32 %v167_v45, %v147_v44 }
 0x33f   :  { %v171_v47 = vsel %vm170_vm7, %v168_v46, -inf }
 0x340   :  { %172 = vmax.xlane.f32.xlu2 %v171_v47 }
 0x3b3   :  { %v173_v48 = vpop.xlane.xlu2 %172 }
 0x3b4   :  { %v174_v49 = vsub.f32 %v168_v46, %v173_v48 }
 0x3b6   :  { %v175_v50 = vmul.f32 1.442695, %v174_v49 }
 0x3b8   :  { %239 = vpow2.f32 %v175_v50 }
 0x3be   :  { %v240_v51 = vpop.eup %239 }
 0x3bf   :  { %v177_v52 = vsel %vm170_vm7, %v240_v51, 0.0 }
 0x3c0   :  { %178 = vadd.xlane.f32.xlu0 %v177_v52 }
 0x433   :  { %v179_v53 = vpop.xlane.xlu0 %178 }
 0x434   :  { %241 = vlog2.f32 %v179_v53 }
 0x43a   :  { %v242_v54 = vpop.eup %241 }
 0x43b   :  { %v181_v55 = vmul.f32 0.6931472, %v242_v54 }
 0x43d   :  { %v182_v56 = vsub.f32 %v174_v49, %v181_v55 }
 0x43f   :  { %184 = vst.msk [vmem:[#allocation7] sm:$0x1] %vm183_vm8, %v182_v56 }
 0x440   :  { %195 = dma.vmem_to_hbm [thread:$0]  %s191_s14, 16, %s193_s17, [#allocation6]  }
 0x441   :  { %317 = dma.done.wait [#allocation6], 16  }
 0x442   :  { %318 = vsyncadd [#allocation6], 4294967280 }
 0x443   :  { %319 = dma.done.wait [#allocation9], 16  }
 0x444   :  { %320 = vsyncadd [#allocation9], 4294967280 }
 0x445   :  { %215 = vsyncpa [#allocation5], 1 }
 0x446   :  { %216 = vsyncpa [#allocation6], 1 }
 0x447   :  { %217 = vsyncpa [#allocation9], 1 }

</bundles_post_ra>
